<compile_context>
chip_gen: v5e
topology: v5e:2x2
jax: 0.10.0
libtpu: 0.0.40
codegen_flags: <defaults>
</compile_context>

<pallas_src>
import math

import jax
import jax.numpy as jnp
from jax.experimental import pallas as pl
from jax.experimental.pallas import tpu as pltpu


def _batch_tile(n, row_bytes, budget_bytes=8 << 20):
    """Largest batch tile whose double-buffered (in + out) blocks fit the budget."""
    # Per grid step: input blocks (tb * row_bytes/2) + output block
    # (tb * row_bytes/2), x2 for double buffering  ==  2 * tb * row_bytes.
    cap = max(1, budget_bytes // max(1, 2 * row_bytes))
    if n <= cap:
        return n                    # whole batch in one block (tb == full dim)
    if cap >= 8:
        return (cap // 8) * 8       # second-minor block dim must be multiple of 8
    return min(n, 8)


def concatenate_layer(*xs, use_pallas=None):
    """Pallas implementation of ConcatenateLayer.forward(*x) == torch.cat(x, dim=1)."""
    xs = tuple(jnp.asarray(x) for x in xs)
    assert len(xs) >= 1, "need at least one input"
    n = xs[0].shape[0]
    trailing = xs[0].shape[2:]
    for x in xs:
        assert x.ndim >= 2 and x.shape[0] == n and x.shape[2:] == trailing, (
            x.shape, xs[0].shape)
    dtype = jnp.result_type(*xs)
    xs = tuple(x.astype(dtype) for x in xs)

    c_sizes = tuple(int(x.shape[1]) for x in xs)
    c_total = sum(c_sizes)
    hw = int(math.prod(trailing)) if trailing else 1
    out_shape_full = (n, c_total) + trailing
    itemsize = jnp.dtype(dtype).itemsize

    total_bytes = 2 * n * c_total * hw * itemsize      # one read + one write
    if use_pallas is None:
        use_pallas = total_bytes >= (1 << 20)          # XLA wins for tiny copies
    if not use_pallas:
        return jnp.concatenate(xs, axis=1)

    # Lane-dense layout: collapse (C_i, H, W) into one trailing axis (free,
    # row-major reshape).  Channel concat becomes lane concat at static
    # offsets that are multiples of H*W.
    xs2 = tuple(x.reshape(n, c * hw) for x, c in zip(xs, c_sizes))
    lane_widths = tuple(c * hw for c in c_sizes)
    lane_starts = []
    off = 0
    for w in lane_widths:
        lane_starts.append(off)
        off += w
    lane_starts = tuple(lane_starts)
    assert off == c_total * hw  # concat exactly fills the output channel axis

    row_bytes = 2 * c_total * hw * itemsize            # in + out bytes per batch row
    tb = _batch_tile(n, row_bytes)
    grid = (pl.cdiv(n, tb),)

    def kernel(*refs):
        in_refs, out_ref = refs[:-1], refs[-1]
        # Hot path: one contiguous, lane-aligned store per input chunk.
        for r, s, w in zip(in_refs, lane_starts, lane_widths):
            out_ref[:, pl.ds(s, w)] = r[...]

    in_specs = [pl.BlockSpec((tb, w), lambda i: (i, 0)) for w in lane_widths]
    out_spec = pl.BlockSpec((tb, c_total * hw), lambda i: (i, 0))

    out2 = pl.pallas_call(
        kernel,
        out_shape=jax.ShapeDtypeStruct((n, c_total * hw), dtype),
        grid_spec=pltpu.PrefetchScalarGridSpec(
            num_scalar_prefetch=0,
            grid=grid,
            in_specs=in_specs,
            out_specs=out_spec,
        ),
        compiler_params=pltpu.CompilerParams(
            dimension_semantics=("parallel",),   # shard batch copy across v7x TCs
        ),
    )(*xs2)
    return out2.reshape(out_shape_full)


if __name__ == "__main__":
    key = jax.random.PRNGKey(0)
    k0, k1, k2 = jax.random.split(key, 3)

    # Small deterministic NCHW inputs with different channel counts.
    x0 = jax.random.normal(k0, (2, 2, 16, 16), dtype=jnp.float32)
    x1 = jax.random.normal(k1, (2, 3, 16, 16), dtype=jnp.float32)
    x2 = jax.random.normal(k2, (2, 3, 16, 16), dtype=jnp.float32)

    # Force the Pallas path (auto-dispatch would choose plain XLA for 16 KiB).
    out = concatenate_layer(x0, x1, x2, use_pallas=True)
    out = jax.block_until_ready(out)

    ref = jnp.concatenate([x0, x1, x2], axis=1)
    assert out.shape == ref.shape, (out.shape, ref.shape)
    assert out.dtype == ref.dtype, (out.dtype, ref.dtype)
    assert jnp.array_equal(out, ref), "mismatch between kernel and reference"

    print("KERNEL_OK")
</pallas_src>

<mosaic_0001>
module attributes {stable_mosaic.version = 11 : i64} {
  func.func @kernel(%arg0: i32, %arg1: memref<2x512xf32, #tpu.memory_space<vmem>>, %arg2: memref<2x768xf32, #tpu.memory_space<vmem>>, %arg3: memref<2x768xf32, #tpu.memory_space<vmem>>, %arg4: memref<2x2048xf32, #tpu.memory_space<vmem>>) attributes {dimension_semantics = [#tpu.dimension_semantics<parallel>], iteration_bounds = array<i64: 1>, scalar_prefetch = 0 : i64, scratch_operands = 0 : i64, tpu.core_type = #tpu.core_type<tc>, window_params = [{transform_indices = @transform_0, window_bounds = array<i64: 2, 512>}, {transform_indices = @transform_1, window_bounds = array<i64: 2, 768>}, {transform_indices = @transform_2, window_bounds = array<i64: 2, 768>}, {transform_indices = @transform_3, window_bounds = array<i64: 2, 2048>}]} {
    %c0 = arith.constant 0 : index
    %c0_0 = arith.constant 0 : index
    %0 = vector.load %arg1[%c0, %c0_0] : memref<2x512xf32, #tpu.memory_space<vmem>>, vector<2x512xf32>
    %c0_1 = arith.constant 0 : index
    %c0_2 = arith.constant 0 : index
    %1 = vector.load %arg4[%c0_1, %c0_2] : memref<2x2048xf32, #tpu.memory_space<vmem>>, vector<2x512xf32>
    tpu.vector_store %arg4[%c0_1, %c0_2], %0 {strides = array<i32>} : memref<2x2048xf32, #tpu.memory_space<vmem>>, vector<2x512xf32>,
    %c0_3 = arith.constant 0 : index
    %c0_4 = arith.constant 0 : index
    %2 = vector.load %arg2[%c0_3, %c0_4] : memref<2x768xf32, #tpu.memory_space<vmem>>, vector<2x768xf32>
    %c0_5 = arith.constant 0 : index
    %c512 = arith.constant 512 : index
    %3 = vector.load %arg4[%c0_5, %c512] : memref<2x2048xf32, #tpu.memory_space<vmem>>, vector<2x768xf32>
    tpu.vector_store %arg4[%c0_5, %c512], %2 {strides = array<i32>} : memref<2x2048xf32, #tpu.memory_space<vmem>>, vector<2x768xf32>,
    %c0_6 = arith.constant 0 : index
    %c0_7 = arith.constant 0 : index
    %4 = vector.load %arg3[%c0_6, %c0_7] : memref<2x768xf32, #tpu.memory_space<vmem>>, vector<2x768xf32>
    %c0_8 = arith.constant 0 : index
    %c1280 = arith.constant 1280 : index
    %5 = vector.load %arg4[%c0_8, %c1280] : memref<2x2048xf32, #tpu.memory_space<vmem>>, vector<2x768xf32>
    tpu.vector_store %arg4[%c0_8, %c1280], %4 {strides = array<i32>} : memref<2x2048xf32, #tpu.memory_space<vmem>>, vector<2x768xf32>,
    return
  }
  func.func @transform_0(%arg0: i32) -> (i32, i32) {
    %c0_i32 = arith.constant 0 : i32
    %c0_i32_0 = arith.constant 0 : i32
    return %arg0, %c0_i32 : i32, i32
  }
  func.func @transform_1(%arg0: i32) -> (i32, i32) {
    %c0_i32 = arith.constant 0 : i32
    %c0_i32_0 = arith.constant 0 : i32
    return %arg0, %c0_i32 : i32, i32
  }
  func.func @transform_2(%arg0: i32) -> (i32, i32) {
    %c0_i32 = arith.constant 0 : i32
    %c0_i32_0 = arith.constant 0 : i32
    return %arg0, %c0_i32 : i32, i32
  }
  func.func @transform_3(%arg0: i32) -> (i32, i32) {
    %c0_i32 = arith.constant 0 : i32
    %c0_i32_0 = arith.constant 0 : i32
    return %arg0, %c0_i32 : i32, i32
  }
}

</mosaic_0001>

<bundles_post_ra>
// kernel: tpu_custom_call.1
= control target key start
LH: loop header
LB: loop body
LE: loop exit
PB: predicated region body
PF: predicated region fallthrough
CT: control target
= control target key end

     0   :  { %8 = vsyncpa [#allocation3], 0  ;;  %s226_s0 = inlined_call_operand.hbm [shape: f32[2,512], index: 0, kind: input, shape index: {}]   ;;  %s227_s1 = inlined_call_operand.hbm [shape: f32[2,768], index: 1, kind: input, shape index: {}]   ;;  %s228_s2 = inlined_call_operand.hbm [shape: f32[2,768], index: 2, kind: input, shape index: {}]   ;;  %s229_s3 = inlined_call_operand.hbm [shape: f32[2,2048], index: 3, kind: output, shape index: {}]  }
   0x1   :  { %9 = vsyncpa [#allocation6], 0  ;;  %s27_s14 = sshll.u32 %s227_s1, 4  ;;  %s28_s14 = int_to_ptr.hbm [resolvable:$true] %s27_s14 }
   0x2   :  { %10 = vsyncpa [#allocation4], 0  ;;  %s190_s15 = smov [#allocation5]   ;;  %s16_s19 = sshll.u32 %s226_s0, 4  ;;  %s17_s19 = int_to_ptr.hbm [resolvable:$true] %s16_s19 }
   0x3   :  { %s29_s16 = sshll.u32 %s190_s15, 4  ;;  %s191_s20 = smov [#allocation2]   ;;  %s30_s16 = int_to_ptr.vmem [resolvable:$true] %s29_s16 }
   0x4   :  { %32 = dma.hbm_to_vmem [thread:$0]  %s28_s14, 192, %s30_s16, [#allocation6]  }
   0x5   :  { %s18_s21 = sshll.u32 %s191_s20, 4  ;;  %s38_s24 = sshll.u32 %s228_s2, 4  ;;  %s19_s21 = int_to_ptr.vmem [resolvable:$true] %s18_s21  ;;  %s39_s24 = int_to_ptr.hbm [resolvable:$true] %s38_s24 }
   0x6   :  { %21 = dma.hbm_to_vmem [thread:$0]  %s17_s19, 128, %s19_s21, [#allocation3]  }
   0x7   :  { %s192_s1 = smov [#allocation7]  }
   0x8   :  { %s40_s25 = sshll.u32 %s192_s1, 4  ;;  %s41_s25 = int_to_ptr.vmem [resolvable:$true] %s40_s25 }
   0x9   :  { %43 = dma.hbm_to_vmem [thread:$0]  %s39_s24, 192, %s41_s25, [#allocation6]  }
   0xa   :  { %184 = dma.done.wait [#allocation3], 128  }
   0xb   :  { %185 = vsyncadd [#allocation3], 4294967168 }
   0xc   :  { %186 = dma.done.wait [#allocation6], 384  }
   0xd   :  { %187 = vsyncadd [#allocation6], 4294966912  ;;  %v56_v0 = vld [vmem:[#allocation2] sm:$0xff]  ;;  %v58_v1 = vld [vmem:[#allocation5] sm:$0xff]  ;;  %s193_s0 = smov [#allocation8]   ;;  %s73_s2 = sshll.u32 %s229_s3, 4  ;;  %s74_s2 = int_to_ptr.hbm [resolvable:$true] %s73_s2 }
   0xe   :  { %v59_v2 = vld [vmem:[#allocation5 + $0x8] sm:$0xf]  ;;  %s71_s26 = sshll.u32 %s193_s0, 4  ;;  %57 = vst [vmem:[#allocation8] sm:$0xff] %v56_v0  ;;  %v62_v3 = vld [vmem:[#allocation7] sm:$0xff]  ;;  %s72_s26 = int_to_ptr.vmem [resolvable:$true] %s71_s26 }
   0xf   :  { %60 = vst [vmem:[#allocation8 + $0x8] sm:$0xff] %v58_v1  ;;  %v63_v4 = vld [vmem:[#allocation7 + $0x8] sm:$0xf] }
  0x10   :  { %61 = vst [vmem:[#allocation8 + $0x10] sm:$0xf] %v59_v2 }
  0x11   :  { %64 = vst [vmem:[#allocation8 + $0x14] sm:$0xff] %v62_v3 }
  0x12   :  { %65 = vst [vmem:[#allocation8 + $0x1c] sm:$0xf] %v63_v4 }
  0x13   :  { %76 = dma.vmem_to_hbm [thread:$0]  %s72_s26, 512, %s74_s2, [#allocation4]  }
  0x14   :  { %188 = dma.done.wait [#allocation4], 512  }
  0x15   :  { %189 = vsyncadd [#allocation4], 4294966784 }
  0x16   :  { %81 = vsyncpa [#allocation3], 1 }
  0x17   :  { %82 = vsyncpa [#allocation6], 1 }
  0x18   :  { %83 = vsyncpa [#allocation4], 1 }

</bundles_post_ra>
